<compile_context>
chip_gen: v5e
topology: v5e:2x2
jax: 0.10.0
libtpu: 0.0.40
codegen_flags: <defaults>
</compile_context>

<pallas_src>
import functools

import jax
import jax.numpy as jnp
from jax import lax
from jax.experimental import pallas as pl
from jax.experimental.pallas import tpu as pltpu

EPS = 1e-5


def _physical_vmem_bytes():
    """Per-core VMEM capacity; conservative (v7x-sized) default if the query fails."""
    try:
        return int(pltpu.get_tpu_info().vmem_capacity_bytes)
    except Exception:
        return 64 * 1024 * 1024


# ---------------------------------------------------------------------------
# In-kernel math
# ---------------------------------------------------------------------------

def _bn_fold(z, gamma, beta):
    """Train-mode BatchNorm1d over the batch axis, folded to one scale/shift.

    z: (B, tn) f32 pre-norm activations (full batch, one tile of channels).
    Centered variance avoids cancellation; per-element work is z * scale + shift.
    """
    mean = jnp.mean(z, axis=0, keepdims=True)
    var = jnp.mean(jnp.square(z - mean), axis=0, keepdims=True)
    scale = gamma * lax.rsqrt(var + EPS)
    shift = beta - mean * scale
    return z * scale + shift


def _fused_kernel(x_ref, w1_ref, w2_ref, gb1_ref, gb2_ref, o_ref):
    """out = ReLU( BN2( ReLU(BN1(x @ W1)) @ W2 ) + x ), whole block in one kernel."""
    mm_dtype = w1_ref.dtype
    x_f32 = x_ref[...].astype(jnp.float32)
    gb1 = gb1_ref[...]
    gb2 = gb2_ref[...]
    z1 = jnp.dot(x_f32.astype(mm_dtype), w1_ref[...],
                 preferred_element_type=jnp.float32)
    h = jnp.maximum(_bn_fold(z1, gb1[0:1, :], gb1[1:2, :]), 0.0)
    z2 = jnp.dot(h.astype(mm_dtype), w2_ref[...],
                 preferred_element_type=jnp.float32)
    z2 = _bn_fold(z2, gb2[0:1, :], gb2[1:2, :])
    o_ref[...] = jnp.maximum(z2 + x_f32, 0.0).astype(o_ref.dtype)


def _fc1_kernel(x_ref, w_ref, gb_ref, h_ref):
    # h[:, tile] = ReLU(BN1(x @ W1[:, tile]))
    z = jnp.dot(x_ref[...].astype(w_ref.dtype), w_ref[...],
                preferred_element_type=jnp.float32)
    gb = gb_ref[...]
    z = _bn_fold(z, gb[0:1, :], gb[1:2, :])
    h_ref[...] = jnp.maximum(z, 0.0).astype(h_ref.dtype)


def _fc2_kernel(h_ref, w_ref, gb_ref, xres_ref, o_ref):
    # out[:, tile] = ReLU(BN2(h @ W2[:, tile]) + x[:, tile])
    z = jnp.dot(h_ref[...].astype(w_ref.dtype), w_ref[...],
                preferred_element_type=jnp.float32)
    gb = gb_ref[...]
    z = _bn_fold(z, gb[0:1, :], gb[1:2, :])
    o_ref[...] = jnp.maximum(z + xres_ref[...].astype(jnp.float32), 0.0).astype(o_ref.dtype)


# ---------------------------------------------------------------------------
# VMEM sizing / tile picking
# ---------------------------------------------------------------------------

def _fused_vmem_need(B, C, w_itemsize, x_itemsize, out_itemsize):
    return (B * C * x_itemsize            # x (matmul input + residual, DMA'd once)
            + 2 * C * C * w_itemsize      # w1 + w2 (single-buffered: no grid)
            + 4 * C * 4                   # gb1 + gb2
            + B * C * out_itemsize        # out
            + 8 * B * C * 4)              # headroom for f32 intermediates / spill


def _streaming_vmem_need(B, C, tn, w_itemsize, act_itemsize, res_itemsize):
    per_stage = (B * C * act_itemsize     # resident activation (x or h)
                 + C * tn * w_itemsize    # weight column tile
                 + 2 * tn * 4             # packed gamma/beta tile
                 + B * tn * act_itemsize  # output tile
                 + B * tn * res_itemsize) # residual tile (fc2 only; counted for both = slack)
    return 2 * per_stage                  # BlockSpec double-buffers every operand


def _pick_tile_n(B, C, Cout, w_itemsize, act_itemsize, res_itemsize, budget):
    """Largest output-channel tile (multiple of 128 dividing Cout) whose double-buffered
    operand set fits `budget`; prefers >=2 tiles so the 'parallel' grid axis can split
    across v7x's two TensorCores."""
    if Cout % 128 != 0:
        return Cout                       # full-array block is always allowed
    fits = [t for t in range(128, Cout + 1, 128)
            if Cout % t == 0
            and _streaming_vmem_need(B, C, t, w_itemsize, act_itemsize, res_itemsize) <= budget]
    if not fits:
        return 128
    multi = [t for t in fits if Cout // t >= 2]
    return max(multi) if multi else max(fits)


def _weight_spec(C, tn, n_tiles):
    index_map = lambda j: (0, j)
    if n_tiles >= 4:
        # Per-tile compute is tiny when B is small; a 3-deep weight pipeline hides DMA
        # issue latency (most relevant on v7x).  Fall back to depth-2 on older jax.
        try:
            return pl.BlockSpec((C, tn), index_map, pipeline_mode=pl.Buffered(3))
        except TypeError:
            pass
    return pl.BlockSpec((C, tn), index_map)


# ---------------------------------------------------------------------------
# pallas_call wrappers
# ---------------------------------------------------------------------------

def _fused_call(x, w1, w2, gb1, gb2, vmem_limit):
    B, C = x.shape
    cost = pl.CostEstimate(
        flops=4 * B * C * C + 2 * B * C,
        transcendentals=2 * C,
        bytes_accessed=(x.size * x.dtype.itemsize
                        + w1.size * w1.dtype.itemsize
                        + w2.size * w2.dtype.itemsize
                        + (gb1.size + gb2.size) * 4
                        + B * C * x.dtype.itemsize))
    return pl.pallas_call(
        _fused_kernel,
        out_shape=jax.ShapeDtypeStruct((B, C), x.dtype),
        compiler_params=pltpu.CompilerParams(vmem_limit_bytes=vmem_limit),
        cost_estimate=cost,
    )(x, w1, w2, gb1, gb2)


def _fc1_call(x, w, gb, tn, vmem_limit, h_dtype):
    B, C = x.shape
    Cout = w.shape[1]
    n_tiles = Cout // tn
    cost = pl.CostEstimate(
        flops=2 * B * C * Cout,
        transcendentals=Cout,
        bytes_accessed=(x.size * x.dtype.itemsize
                        + w.size * w.dtype.itemsize
                        + gb.size * 4
                        + B * Cout * jnp.dtype(h_dtype).itemsize))
    return pl.pallas_call(
        _fc1_kernel,
        out_shape=jax.ShapeDtypeStruct((B, Cout), h_dtype),
        grid_spec=pl.GridSpec(
            grid=(n_tiles,),
            in_specs=[
                pl.BlockSpec((B, C), lambda j: (0, 0)),     # activations: resident
                _weight_spec(C, tn, n_tiles),               # W1 column tiles: streamed
                pl.BlockSpec((2, tn), lambda j: (0, j)),    # packed gamma/beta tile
            ],
            out_specs=pl.BlockSpec((B, tn), lambda j: (0, j)),
        ),
        compiler_params=pltpu.CompilerParams(
            dimension_semantics=("parallel",),              # tiles independent -> megacore-safe
            vmem_limit_bytes=vmem_limit),
        cost_estimate=cost,
    )(x, w, gb)


def _fc2_call(h, w, gb, x_res, tn, vmem_limit):
    B, C = h.shape
    Cout = w.shape[1]
    n_tiles = Cout // tn
    cost = pl.CostEstimate(
        flops=2 * B * C * Cout + 2 * B * Cout,
        transcendentals=Cout,
        bytes_accessed=(h.size * h.dtype.itemsize
                        + w.size * w.dtype.itemsize
                        + gb.size * 4
                        + x_res.size * x_res.dtype.itemsize
                        + B * Cout * x_res.dtype.itemsize))
    return pl.pallas_call(
        _fc2_kernel,
        out_shape=jax.ShapeDtypeStruct((B, Cout), x_res.dtype),
        grid_spec=pl.GridSpec(
            grid=(n_tiles,),
            in_specs=[
                pl.BlockSpec((B, C), lambda j: (0, 0)),     # h: resident
                _weight_spec(C, tn, n_tiles),               # W2 column tiles: streamed
                pl.BlockSpec((2, tn), lambda j: (0, j)),    # packed gamma/beta tile
                pl.BlockSpec((B, tn), lambda j: (0, j)),    # residual x tile
            ],
            out_specs=pl.BlockSpec((B, tn), lambda j: (0, j)),
        ),
        compiler_params=pltpu.CompilerParams(
            dimension_semantics=("parallel",),
            vmem_limit_bytes=vmem_limit),
        cost_estimate=cost,
    )(h, w, gb, x_res)


# ---------------------------------------------------------------------------
# Public API
# ---------------------------------------------------------------------------

def prepare_params(w1, b1, g1, be1, w2, b2, g2, be2, *, mm_dtype=jnp.bfloat16):
    """One-time (outside-jit) parameter conversion.

    * w1/w2 arrive in torch nn.Linear layout (out, in); stored transposed as (in, out)
      and cast to the MXU dtype ONCE, so the per-step jit reads them directly (no
      per-call f32->bf16 weight copy through HBM).
    * b1/b2 are accepted for interface parity but unused: a Linear bias followed
      immediately by train-mode BN is removed exactly by the mean subtraction and does
      not affect the variance.
    * gamma/beta are packed into a single (2, C) f32 array per layer so each layer
      (or tile) needs one small DMA instead of two.
    """
    del b1, b2
    f32 = jnp.float32
    return dict(
        w1=jnp.asarray(w1).T.astype(mm_dtype),
        w2=jnp.asarray(w2).T.astype(mm_dtype),
        gb1=jnp.stack([jnp.asarray(g1, f32), jnp.asarray(be1, f32)], axis=0),
        gb2=jnp.stack([jnp.asarray(g2, f32), jnp.asarray(be2, f32)], axis=0),
    )


@functools.partial(jax.jit, static_argnames=("tile_n",))
def res_fc_block(x, w1, w2, gb1, gb2, *, tile_n=None):
    """ResFCBlock forward (train-mode BN).  Params come from prepare_params().

    tile_n=None  -> fused single-kernel path when it fits VMEM, else auto-tiled streaming.
    tile_n=<int> -> force the two-call streaming path with that output-channel tile.
    """
    # TODO(synk): BatchNorm running-mean/var (momentum) buffer updates are not produced;
    # only the train-mode forward output is computed.
    B, C = x.shape
    assert w1.shape == (C, C) and w2.shape == (C, C)
    assert gb1.shape == (2, C) and gb2.shape == (2, C)

    phys = _physical_vmem_bytes()
    vmem_limit = int(min(3 * phys // 4, 112 * 1024 * 1024))
    w_isz = w1.dtype.itemsize
    x_isz = x.dtype.itemsize

    # Fused path: both weight matrices + activations resident in VMEM, h never touches
    # HBM, x DMA'd once, one kernel dispatch.
    if tile_n is None and _fused_vmem_need(B, C, w_isz, x_isz, x_isz) <= phys // 2:
        return _fused_call(x, w1, w2, gb1, gb2, vmem_limit)

    # Streaming path (large C or explicitly requested): each layer tiled over its OUTPUT
    # channels.  BN stats are per output channel over the whole batch, so every tile is
    # independent -> "parallel" grid (v7x megacore splits tiles across its two cores).
    budget = phys // 2
    h_dtype = w1.dtype   # narrow h halves the inter-layer HBM round-trip when weights are bf16
    tn = tile_n if tile_n is not None else _pick_tile_n(
        B, C, C, w_isz, max(x_isz, jnp.dtype(h_dtype).itemsize), x_isz, budget)
    assert C % tn == 0
    h = _fc1_call(x, w1, gb1, tn, vmem_limit, h_dtype)
    return _fc2_call(h, w2, gb2, x, tn, vmem_limit)


def res_fc_block_ref(x, w1, b1, g1, be1, w2, b2, g2, be2):
    """Pure-JAX reference matching the PyTorch module (torch weight layout, biases incl.)."""
    hp = lax.Precision.HIGHEST

    def bn(h, g, b):
        m = jnp.mean(h, axis=0, keepdims=True)
        v = jnp.mean((h - m) ** 2, axis=0, keepdims=True)
        return (h - m) / jnp.sqrt(v + EPS) * g + b

    h = jnp.maximum(bn(jnp.dot(x, w1.T, precision=hp) + b1, g1, be1), 0.0)
    h2 = bn(jnp.dot(h, w2.T, precision=hp) + b2, g2, be2)
    return jnp.maximum(h2 + x, 0.0)


if __name__ == "__main__":
    def make_inputs(key, B, C):
        kx, kw1, kb1, kg1, kbe1, kw2, kb2, kg2, kbe2 = jax.random.split(key, 9)
        x = jax.random.normal(kx, (B, C), jnp.float32)
        scale = 1.0 / jnp.sqrt(C)
        # torch nn.Linear layout: (out, in)
        w1 = jax.random.uniform(kw1, (C, C), jnp.float32, -scale, scale)
        b1 = jax.random.uniform(kb1, (C,), jnp.float32, -scale, scale)
        w2 = jax.random.uniform(kw2, (C, C), jnp.float32, -scale, scale)
        b2 = jax.random.uniform(kb2, (C,), jnp.float32, -scale, scale)
        g1 = 1.0 + 0.1 * jax.random.normal(kg1, (C,), jnp.float32)
        be1 = 0.1 * jax.random.normal(kbe1, (C,), jnp.float32)
        g2 = 1.0 + 0.1 * jax.random.normal(kg2, (C,), jnp.float32)
        be2 = 0.1 * jax.random.normal(kbe2, (C,), jnp.float32)
        return x, (w1, b1, g1, be1, w2, b2, g2, be2)

    key = jax.random.PRNGKey(0)
    k1, k2 = jax.random.split(key)

    # 1) ResFCBlock(256), B=8: fused single-kernel path, bf16 MXU operands
    #    (weights converted ONCE outside the jit).
    B, C = 8, 256
    x, params = make_inputs(k1, B, C)
    ref = res_fc_block_ref(x, *params)
    p_bf16 = prepare_params(*params)
    out = jax.block_until_ready(res_fc_block(x, **p_bf16))
    assert out.shape == (B, C) and out.dtype == x.dtype
    assert jnp.allclose(out, ref, atol=1e-1, rtol=1e-1), (
        float(jnp.max(jnp.abs(out - ref))))

    # 2) Same shapes, f32 weights, forced streaming path with 2 output tiles per layer:
    #    tight validation of the bias-drop + folded-BN algebra and the two-call design.
    p_f32 = prepare_params(*params, mm_dtype=jnp.float32)
    out_f32 = jax.block_until_ready(res_fc_block(x, **p_f32, tile_n=128))
    assert jnp.allclose(out_f32, ref, atol=1e-3, rtol=1e-3), (
        float(jnp.max(jnp.abs(out_f32 - ref))))

    # 3) Larger C, forced 128-wide tiles (4 tiles/layer): exercises the streamed,
    #    "parallel" grid with the deeper (3-buffer) weight pipeline.
    B2, C2 = 8, 512
    x2, params2 = make_inputs(k2, B2, C2)
    ref2 = res_fc_block_ref(x2, *params2)
    p2 = prepare_params(*params2, mm_dtype=jnp.float32)
    out2 = jax.block_until_ready(res_fc_block(x2, **p2, tile_n=128))
    assert jnp.allclose(out2, ref2, atol=2e-3, rtol=2e-3), (
        float(jnp.max(jnp.abs(out2 - ref2))))

    print("KERNEL_OK")
</pallas_src>

<mosaic_0001>
module attributes {stable_mosaic.version = 11 : i64} {
  func.func @_fused_kernel(%arg0: memref<8x256xf32, #tpu.memory_space<vmem>>, %arg1: memref<256x256xbf16, #tpu.memory_space<vmem>>, %arg2: memref<256x256xbf16, #tpu.memory_space<vmem>>, %arg3: memref<2x256xf32, #tpu.memory_space<vmem>>, %arg4: memref<2x256xf32, #tpu.memory_space<vmem>>, %arg5: memref<8x256xf32, #tpu.memory_space<vmem>>) attributes {dimension_semantics = [], scalar_prefetch = 0 : i64, scratch_operands = 0 : i64, tpu.core_type = #tpu.core_type<tc>} {
    %c0 = arith.constant 0 : index
    %c0_0 = arith.constant 0 : index
    %0 = vector.load %arg0[%c0, %c0_0] : memref<8x256xf32, #tpu.memory_space<vmem>>, vector<8x256xf32>
    %c0_1 = arith.constant 0 : index
    %c0_2 = arith.constant 0 : index
    %1 = vector.load %arg3[%c0_1, %c0_2] : memref<2x256xf32, #tpu.memory_space<vmem>>, vector<2x256xf32>
    %c0_3 = arith.constant 0 : index
    %c0_4 = arith.constant 0 : index
    %2 = vector.load %arg4[%c0_3, %c0_4] : memref<2x256xf32, #tpu.memory_space<vmem>>, vector<2x256xf32>
    %3 = arith.truncf %0 : vector<8x256xf32> to vector<8x256xbf16>
    %c0_5 = arith.constant 0 : index
    %c0_6 = arith.constant 0 : index
    %4 = vector.load %arg1[%c0_5, %c0_6] : memref<256x256xbf16, #tpu.memory_space<vmem>>, vector<256x256xbf16>
    %cst = arith.constant dense<0.000000e+00> : vector<8x256xf32>
    %5 = tpu.matmul %3, %4, %cst {dimension_numbers = #tpu.dot_dimension_numbers<[1], [0], [0], [1], [0, 0, 1, 1], [], []>} : vector<8x256xbf16>, vector<256x256xbf16>, vector<8x256xf32> -> vector<8x256xf32>
    %6 = vector.extract_strided_slice %1 {offsets = [0, 0], sizes = [1, 256], strides = [1, 1]} : vector<2x256xf32> to vector<1x256xf32>
    %7 = vector.extract_strided_slice %1 {offsets = [1, 0], sizes = [1, 256], strides = [1, 1]} : vector<2x256xf32> to vector<1x256xf32>
    %cst_7 = arith.constant dense<0.000000e+00> : vector<256xf32>
    %8 = vector.multi_reduction <add>, %5, %cst_7 [0] : vector<8x256xf32> to vector<256xf32>
    %9 = vector.shape_cast %8 : vector<256xf32> to vector<1x256xf32>
    %cst_8 = arith.constant 8.000000e+00 : f32
    %10 = vector.broadcast %cst_8 : f32 to vector<1x256xf32>
    %11 = arith.divf %9, %10 : vector<1x256xf32>
    %12 = vector.broadcast %11 : vector<1x256xf32> to vector<8x256xf32>
    %13 = arith.subf %5, %12 : vector<8x256xf32>
    %14 = arith.mulf %13, %13 : vector<8x256xf32>
    %cst_9 = arith.constant dense<0.000000e+00> : vector<256xf32>
    %15 = vector.multi_reduction <add>, %14, %cst_9 [0] : vector<8x256xf32> to vector<256xf32>
    %16 = vector.shape_cast %15 : vector<256xf32> to vector<1x256xf32>
    %cst_10 = arith.constant 8.000000e+00 : f32
    %17 = vector.broadcast %cst_10 : f32 to vector<1x256xf32>
    %18 = arith.divf %16, %17 : vector<1x256xf32>
    %cst_11 = arith.constant 9.99999974E-6 : f32
    %19 = vector.broadcast %cst_11 : f32 to vector<1x256xf32>
    %20 = arith.addf %18, %19 : vector<1x256xf32>
    %21 = math.rsqrt %20 : vector<1x256xf32>
    %22 = arith.mulf %6, %21 : vector<1x256xf32>
    %23 = arith.mulf %11, %22 : vector<1x256xf32>
    %24 = arith.subf %7, %23 : vector<1x256xf32>
    %25 = vector.broadcast %22 : vector<1x256xf32> to vector<8x256xf32>
    %26 = arith.mulf %5, %25 : vector<8x256xf32>
    %27 = vector.broadcast %24 : vector<1x256xf32> to vector<8x256xf32>
    %28 = arith.addf %26, %27 : vector<8x256xf32>
    %cst_12 = arith.constant 0.000000e+00 : f32
    %29 = vector.broadcast %cst_12 : f32 to vector<8x256xf32>
    %30 = arith.maximumf %28, %29 : vector<8x256xf32>
    %31 = arith.truncf %30 : vector<8x256xf32> to vector<8x256xbf16>
    %c0_13 = arith.constant 0 : index
    %c0_14 = arith.constant 0 : index
    %32 = vector.load %arg2[%c0_13, %c0_14] : memref<256x256xbf16, #tpu.memory_space<vmem>>, vector<256x256xbf16>
    %cst_15 = arith.constant dense<0.000000e+00> : vector<8x256xf32>
    %33 = tpu.matmul %31, %32, %cst_15 {dimension_numbers = #tpu.dot_dimension_numbers<[1], [0], [0], [1], [0, 0, 1, 1], [], []>} : vector<8x256xbf16>, vector<256x256xbf16>, vector<8x256xf32> -> vector<8x256xf32>
    %34 = vector.extract_strided_slice %2 {offsets = [0, 0], sizes = [1, 256], strides = [1, 1]} : vector<2x256xf32> to vector<1x256xf32>
    %35 = vector.extract_strided_slice %2 {offsets = [1, 0], sizes = [1, 256], strides = [1, 1]} : vector<2x256xf32> to vector<1x256xf32>
    %cst_16 = arith.constant dense<0.000000e+00> : vector<256xf32>
    %36 = vector.multi_reduction <add>, %33, %cst_16 [0] : vector<8x256xf32> to vector<256xf32>
    %37 = vector.shape_cast %36 : vector<256xf32> to vector<1x256xf32>
    %cst_17 = arith.constant 8.000000e+00 : f32
    %38 = vector.broadcast %cst_17 : f32 to vector<1x256xf32>
    %39 = arith.divf %37, %38 : vector<1x256xf32>
    %40 = vector.broadcast %39 : vector<1x256xf32> to vector<8x256xf32>
    %41 = arith.subf %33, %40 : vector<8x256xf32>
    %42 = arith.mulf %41, %41 : vector<8x256xf32>
    %cst_18 = arith.constant dense<0.000000e+00> : vector<256xf32>
    %43 = vector.multi_reduction <add>, %42, %cst_18 [0] : vector<8x256xf32> to vector<256xf32>
    %44 = vector.shape_cast %43 : vector<256xf32> to vector<1x256xf32>
    %cst_19 = arith.constant 8.000000e+00 : f32
    %45 = vector.broadcast %cst_19 : f32 to vector<1x256xf32>
    %46 = arith.divf %44, %45 : vector<1x256xf32>
    %cst_20 = arith.constant 9.99999974E-6 : f32
    %47 = vector.broadcast %cst_20 : f32 to vector<1x256xf32>
    %48 = arith.addf %46, %47 : vector<1x256xf32>
    %49 = math.rsqrt %48 : vector<1x256xf32>
    %50 = arith.mulf %34, %49 : vector<1x256xf32>
    %51 = arith.mulf %39, %50 : vector<1x256xf32>
    %52 = arith.subf %35, %51 : vector<1x256xf32>
    %53 = vector.broadcast %50 : vector<1x256xf32> to vector<8x256xf32>
    %54 = arith.mulf %33, %53 : vector<8x256xf32>
    %55 = vector.broadcast %52 : vector<1x256xf32> to vector<8x256xf32>
    %56 = arith.addf %54, %55 : vector<8x256xf32>
    %57 = arith.addf %56, %0 : vector<8x256xf32>
    %cst_21 = arith.constant 0.000000e+00 : f32
    %58 = vector.broadcast %cst_21 : f32 to vector<8x256xf32>
    %59 = arith.maximumf %57, %58 : vector<8x256xf32>
    %c0_22 = arith.constant 0 : index
    %c0_23 = arith.constant 0 : index
    %60 = vector.load %arg5[%c0_22, %c0_23] : memref<8x256xf32, #tpu.memory_space<vmem>>, vector<8x256xf32>
    tpu.vector_store %arg5[%c0_22, %c0_23], %59 {strides = array<i32>} : memref<8x256xf32, #tpu.memory_space<vmem>>, vector<8x256xf32>,
    return
  }
}

</mosaic_0001>

<bundles_post_ra>
// kernel: res_fc_block.1
= control target key start
LH: loop header
LB: loop body
LE: loop exit
PB: predicated region body
PF: predicated region fallthrough
CT: control target
= control target key end

     0   :  { %10 = vsyncpa [#allocation3], 0  ;;  %s1407_s0 = inlined_call_operand.hbm [shape: f32[8,256], index: 0, kind: input, shape index: {}]   ;;  %s1408_s1 = inlined_call_operand.hbm [shape: bf16[256,256], index: 1, kind: input, shape index: {}]   ;;  %s1409_s2 = inlined_call_operand.hbm [shape: bf16[256,256], index: 2, kind: input, shape index: {}]   ;;  %s1410_s3 = inlined_call_operand.hbm [shape: f32[2,256], index: 3, kind: input, shape index: {}]   ;;  %s1411_s4 = inlined_call_operand.hbm [shape: f32[2,256], index: 4, kind: input, shape index: {}]   ;;  %s1412_s5 = inlined_call_operand.hbm [shape: f32[8,256], index: 5, kind: output, shape index: {}]  }
   0x1   :  { %11 = vsyncpa [#allocation6], 0 }
   0x2   :  { %12 = vsyncpa [#allocation9], 0  ;;  %s29_s20 = sshll.u32 %s1408_s1, 4  ;;  %s30_s20 = int_to_ptr.hbm [resolvable:$true] %s29_s20 }
   0x3   :  { %13 = vsyncpa [#allocation4], 0  ;;  %s1289_s21 = smov [#allocation5]   ;;  %s56_s25 = sshll.u32 %s1410_s3, 4  ;;  %s57_s25 = int_to_ptr.hbm [resolvable:$true] %s56_s25 }
   0x4   :  { %s31_s22 = sshll.u32 %s1289_s21, 4  ;;  %s1290_s26 = smov 128   ;;  %s32_s22 = int_to_ptr.vmem [resolvable:$true] %s31_s22 }
   0x5   :  { %s1291_s27 = smov 8   ;;  %s1292_s28 = smov [#allocation8]  }
   0x6   :  { %37 = dma.hbm_to_vmem [thread:$0]  %s30_s20, 4096, %s32_s22, [#allocation6], %s1290_s26, %s1290_s26, %s1291_s27  }
   0x7   :  { %s58_s29 = sshll.u32 %s1292_s28, 4  ;;  %s19_s7 = sshll.u32 %s1407_s0, 4  ;;  %s59_s29 = int_to_ptr.vmem [resolvable:$true] %s58_s29  ;;  %s20_s7 = int_to_ptr.hbm [resolvable:$true] %s19_s7 }
   0x8   :  { %61 = dma.hbm_to_vmem [thread:$0]  %s57_s25, 64, %s59_s29, [#allocation9]  }
   0x9   :  { %s42_s9 = sshll.u32 %s1409_s2, 4  ;;  %s1293_s10 = smov [#allocation2]   ;;  %s43_s9 = int_to_ptr.hbm [resolvable:$true] %s42_s9 }
   0xa   :  { %s21_s11 = sshll.u32 %s1293_s10, 4  ;;  %s1294_s3 = smov [#allocation7]   ;;  %s22_s11 = int_to_ptr.vmem [resolvable:$true] %s21_s11 }
   0xb   :  { %24 = dma.hbm_to_vmem [thread:$0]  %s20_s7, 256, %s22_s11, [#allocation3]  }
   0xc   :  { %s44_s12 = sshll.u32 %s1294_s3, 4  ;;  %s67_s15 = sshll.u32 %s1411_s4, 4  ;;  %s45_s12 = int_to_ptr.vmem [resolvable:$true] %s44_s12  ;;  %s68_s15 = int_to_ptr.hbm [resolvable:$true] %s67_s15 }
   0xd   :  { %50 = dma.hbm_to_vmem [thread:$0]  %s43_s9, 4096, %s45_s12, [#allocation6], %s1290_s26, %s1290_s26, %s1291_s27  }
   0xe   :  { %s1295_s0 = smov [#allocation10]  }
   0xf   :  { %s69_s16 = sshll.u32 %s1295_s0, 4  ;;  %s70_s16 = int_to_ptr.vmem [resolvable:$true] %s69_s16 }
  0x10   :  { %72 = dma.hbm_to_vmem [thread:$0]  %s68_s15, 64, %s70_s16, [#allocation9]  }
  0x11   :  { %1281 = dma.done.wait [#allocation3], 256  }
  0x12   :  { %1282 = vsyncadd [#allocation3], 4294967040 }
  0x13   :  { %1283 = dma.done.wait [#allocation6], 8192  }
  0x14   :  { %1284 = vsyncadd [#allocation6], 4294959104 }
  0x15   :  { %1285 = dma.done.wait [#allocation9], 128  }
  0x16   :  { %1286 = vsyncadd [#allocation9], 4294967168  ;;  %v856_v0 = vld [vmem:[#allocation5 + $0x70] sm:$0xf]  ;;  %v1069_v1 = vld [vmem:[#allocation5 + $0x74] sm:$0xf0] }
  0x17   :  { %v920_v2 = vld [vmem:[#allocation5 + $0xf0] sm:$0xf]  ;;  %v857_v3 = vor.u32 %v1069_v1, %v856_v0  ;;  %v1085_v4 = vld [vmem:[#allocation5 + $0xf4] sm:$0xf0]  ;;  %v1068_v5 = vld [vmem:[#allocation5 + $0x74] sm:$0xf] }
  0x18   :  { %v858_v6 = vld [vmem:[#allocation5 + $0x78] sm:$0xf0]  ;;  %v921_v7 = vor.u32 %v1085_v4, %v920_v2  ;;  %v1084_v9 = vld [vmem:[#allocation5 + $0xf4] sm:$0xf]  ;;  %v848_v11 = vld [vmem:[#allocation5 + $0x60] sm:$0xf] }
  0x19   :  { %v861_v8 = vor.u32 %v1068_v5, %v858_v6  ;;  %v922_v10 = vld [vmem:[#allocation5 + $0xf8] sm:$0xf0]  ;;  %291 = vmatpush.bf16.msra.mxu0 %v857_v3  ;;  %v1067_v13 = vld [vmem:[#allocation5 + $0x64] sm:$0xf0]  ;;  %v912_v14 = vld [vmem:[#allocation5 + $0xe0] sm:$0xf] }
  0x1a   :  { %v925_v12 = vor.u32 %v1084_v9, %v922_v10  ;;  %v1083_v15 = vld [vmem:[#allocation5 + $0xe4] sm:$0xf0]  ;;  %304 = vmatpush.bf16.msra.mxu1 %v921_v7  ;;  %v849_v16 = vor.u32 %v1067_v13, %v848_v11  ;;  %v1066_v18 = vld [vmem:[#allocation5 + $0x64] sm:$0xf]  ;;  %v850_v19 = vld [vmem:[#allocation5 + $0x68] sm:$0xf0] }
  0x1b   :  { %317 = vmatpush.bf16.msra.mxu2 %v861_v8  ;;  %v913_v17 = vor.u32 %v1083_v15, %v912_v14  ;;  %v1082_v20 = vld [vmem:[#allocation5 + $0xe4] sm:$0xf]  ;;  %v853_v21 = vor.u32 %v1066_v18, %v850_v19  ;;  %v914_v22 = vld [vmem:[#allocation5 + $0xe8] sm:$0xf0]  ;;  %v840_v23 = vld [vmem:[#allocation5 + $0x50] sm:$0xf] }
  0x1c   :  { %330 = vmatpush.bf16.msra.mxu3 %v925_v12  ;;  %v1065_v24 = vld [vmem:[#allocation5 + $0x54] sm:$0xf0]  ;;  %v917_v25 = vor.u32 %v1082_v20, %v914_v22  ;;  %v904_v26 = vld [vmem:[#allocation5 + $0xd0] sm:$0xf]  ;;  %v1064_v28 = vld [vmem:[#allocation5 + $0x54] sm:$0xf] }
  0x1d   :  { %v1081_v27 = vld [vmem:[#allocation5 + $0xd4] sm:$0xf0]  ;;  %292 = vmatpush.bf16.msra.mxu0 %v849_v16  ;;  %v841_v29 = vor.u32 %v1065_v24, %v840_v23  ;;  %v842_v30 = vld [vmem:[#allocation5 + $0x58] sm:$0xf0]  ;;  %v1080_v31 = vld [vmem:[#allocation5 + $0xd4] sm:$0xf] }
  0x1e   :  { %v906_v32 = vld [vmem:[#allocation5 + $0xd8] sm:$0xf0]  ;;  %305 = vmatpush.bf16.msra.mxu1 %v913_v17  ;;  %v905_v33 = vor.u32 %v1081_v27, %v904_v26  ;;  %v845_v34 = vor.u32 %v1064_v28, %v842_v30  ;;  %v832_v35 = vld [vmem:[#allocation5 + $0x40] sm:$0xf]  ;;  %v1063_v36 = vld [vmem:[#allocation5 + $0x44] sm:$0xf0] }
  0x1f   :  { %318 = vmatpush.bf16.msra.mxu2 %v853_v21  ;;  %v896_v37 = vld [vmem:[#allocation5 + $0xc0] sm:$0xf]  ;;  %v909_v38 = vor.u32 %v1080_v31, %v906_v32  ;;  %v1079_v39 = vld [vmem:[#allocation5 + $0xc4] sm:$0xf0]  ;;  %v1062_v40 = vld [vmem:[#allocation5 + $0x44] sm:$0xf]  ;;  %v833_v44 = vor.u32 %v1063_v36, %v832_v35 }
  0x20   :  { %331 = vmatpush.bf16.msra.mxu3 %v917_v25  ;;  %v834_v41 = vld [vmem:[#allocation5 + $0x48] sm:$0xf0]  ;;  %v1078_v42 = vld [vmem:[#allocation5 + $0xc4] sm:$0xf]  ;;  %v897_v45 = vor.u32 %v1079_v39, %v896_v37  ;;  %v824_v47 = vld [vmem:[#allocation5 + $0x30] sm:$0xf] }
  0x21   :  { %v898_v43 = vld [vmem:[#allocation5 + $0xc8] sm:$0xf0]  ;;  %293 = vmatpush.bf16.msra.mxu0 %v841_v29  ;;  %v837_v46 = vor.u32 %v1062_v40, %v834_v41  ;;  %v1061_v48 = vld [vmem:[#allocation5 + $0x34] sm:$0xf0]  ;;  %v888_v49 = vld [vmem:[#allocation5 + $0xb0] sm:$0xf] }
  0x22   :  { %306 = vmatpush.bf16.msra.mxu1 %v905_v33  ;;  %v901_v50 = vor.u32 %v1078_v42, %v898_v43  ;;  %v1077_v51 = vld [vmem:[#allocation5 + $0xb4] sm:$0xf0]  ;;  %v1060_v52 = vld [vmem:[#allocation5 + $0x34] sm:$0xf]  ;;  %v826_v53 = vld [vmem:[#allocation5 + $0x38] sm:$0xf0]  ;;  %v825_v56 = vor.u32 %v1061_v48, %v824_v47 }
  0x23   :  { %319 = vmatpush.bf16.msra.mxu2 %v845_v34  ;;  %v1076_v54 = vld [vmem:[#allocation5 + $0xb4] sm:$0xf]  ;;  %v890_v55 = vld [vmem:[#allocation5 + $0xb8] sm:$0xf0]  ;;  %v889_v57 = vor.u32 %v1077_v51, %v888_v49  ;;  %v829_v58 = vor.u32 %v1060_v52, %v826_v53  ;;  %v816_v59 = vld [vmem:[#allocation5 + $0x20] sm:$0xf] }
  0x24   :  { %332 = vmatpush.bf16.msra.mxu3 %v909_v38  ;;  %v1059_v60 = vld [vmem:[#allocation5 + $0x24] sm:$0xf0]  ;;  %v880_v61 = vld [vmem:[#allocation5 + $0xa0] sm:$0xf]  ;;  %v893_v62 = vor.u32 %v1076_v54, %v890_v55  ;;  %v1058_v0 = vld [vmem:[#allocation5 + $0x24] sm:$0xf] }
  0x25   :  { %294 = vmatpush.bf16.msra.mxu0 %v833_v44  ;;  %v1075_v63 = vld [vmem:[#allocation5 + $0xa4] sm:$0xf0]  ;;  %v818_v1 = vld [vmem:[#allocation5 + $0x28] sm:$0xf0]  ;;  %v1074_v2 = vld [vmem:[#allocation5 + $0xa4] sm:$0xf]  ;;  %v817_v4 = vor.u32 %v1059_v60, %v816_v59 }
  0x26   :  { %307 = vmatpush.bf16.msra.mxu1 %v897_v45  ;;  %v882_v3 = vld [vmem:[#allocation5 + $0xa8] sm:$0xf0]  ;;  %v881_v5 = vor.u32 %v1075_v63, %v880_v61  ;;  %v821_v6 = vor.u32 %v1058_v0, %v818_v1  ;;  %v808_v7 = vld [vmem:[#allocation5 + $0x10] sm:$0xf]  ;;  %v1057_v8 = vld [vmem:[#allocation5 + $0x14] sm:$0xf0] }
  0x27   :  { %320 = vmatpush.bf16.msra.mxu2 %v837_v46  ;;  %v872_v9 = vld [vmem:[#allocation5 + $0x90] sm:$0xf]  ;;  %v885_v10 = vor.u32 %v1074_v2, %v882_v3  ;;  %v1073_v11 = vld [vmem:[#allocation5 + $0x94] sm:$0xf0]  ;;  %v1056_v12 = vld [vmem:[#allocation5 + $0x14] sm:$0xf]  ;;  %v809_v16 = vor.u32 %v1057_v8, %v808_v7 }
  0x28   :  { %333 = vmatpush.bf16.msra.mxu3 %v901_v50  ;;  %v810_v13 = vld [vmem:[#allocation5 + $0x18] sm:$0xf0]  ;;  %v1072_v14 = vld [vmem:[#allocation5 + $0x94] sm:$0xf]  ;;  %v873_v17 = vor.u32 %v1073_v11, %v872_v9  ;;  %v800_v19 = vld [vmem:[#allocation5] sm:$0xf] }
  0x29   :  { %295 = vmatpush.bf16.msra.mxu0 %v825_v56  ;;  %v874_v15 = vld [vmem:[#allocation5 + $0x98] sm:$0xf0]  ;;  %v813_v18 = vor.u32 %v1056_v12, %v810_v13  ;;  %v1055_v20 = vld [vmem:[#allocation5 + $0x4] sm:$0xf0]  ;;  %v864_v21 = vld [vmem:[#allocation5 + $0x80] sm:$0xf] }
  0x2a   :  { %308 = vmatpush.bf16.msra.mxu1 %v889_v57  ;;  %v877_v22 = vor.u32 %v1072_v14, %v874_v15  ;;  %v1071_v23 = vld [vmem:[#allocation5 + $0x84] sm:$0xf0]  ;;  %v1054_v24 = vld [vmem:[#allocation5 + $0x4] sm:$0xf]  ;;  %v802_v25 = vld [vmem:[#allocation5 + $0x8] sm:$0xf0]  ;;  %v801_v28 = vor.u32 %v1055_v20, %v800_v19 }
  0x2b   :  { %321 = vmatpush.bf16.msra.mxu2 %v829_v58  ;;  %v1070_v26 = vld [vmem:[#allocation5 + $0x84] sm:$0xf]  ;;  %v866_v27 = vld [vmem:[#allocation5 + $0x88] sm:$0xf0]  ;;  %v1343_v29 = vld [vmem:[#allocation2] sm:$0xff]  ;;  %v865_v30 = vor.u32 %v1071_v23, %v864_v21  ;;  %v805_v31 = vor.u32 %v1054_v24, %v802_v25  ;;  %v1296_v36 = vmov 8.0  }
  0x2c   :  { %334 = vmatpush.bf16.msra.mxu3 %v893_v62  ;;  %v1345_v32 = vld [vmem:[#allocation2 + $0x8] sm:$0xff]  ;;  %v869_v33 = vor.u32 %v1070_v26, %v866_v27  ;;  %v97_v34 = vpack.c.bf16 %v1343_v29, %v1343_v29  ;;  %1127 = vrcp.f32 %v1296_v36  ;;  %v1048_v9 = vld [vmem:[#allocation7 + $0xf0] sm:$0xf]  ;;  %v1100_v11 = vld [vmem:[#allocation7 + $0x74] sm:$0xf]  ;;  %vm407_vm6 = vcmask 1041408  }
  0x2d   :  { %296 = vmatpush.bf16.msra.mxu0 %v817_v4  ;;  %v98_v35 = vpack.c.bf16 %v1345_v32, %v1345_v32  ;;  %v986_v14 = vld [vmem:[#allocation7 + $0x78] sm:$0xf0]  ;;  %v1116_v15 = vld [vmem:[#allocation7 + $0xf4] sm:$0xf]  ;;  %v976_v20 = vld [vmem:[#allocation7 + $0x60] sm:$0xf] }
  0x2e   :  { %309 = vmatpush.bf16.msra.mxu1 %v881_v5  ;;  %v984_v5 = vld [vmem:[#allocation7 + $0x70] sm:$0xf]  ;;  %v1099_v21 = vld [vmem:[#allocation7 + $0x64] sm:$0xf0]  ;;  %v1098_v26 = vld [vmem:[#allocation7 + $0x64] sm:$0xf] }
  0x2f   :  { %322 = vmatpush.bf16.msra.mxu2 %v821_v6  ;;  %v1101_v6 = vld [vmem:[#allocation7 + $0x74] sm:$0xf0]  ;;  %v977_v24 = vor.u32 %v1099_v21, %v976_v20  ;;  %v1115_v25 = vld [vmem:[#allocation7 + $0xe4] sm:$0xf0]  ;;  %v944_v21 = vld [vmem:[#allocation7 + $0x20] sm:$0xf] }
  0x30   :  { %335 = vmatpush.bf16.msra.mxu3 %v885_v10  ;;  %v985_v8 = vor.u32 %v1101_v6, %v984_v5  ;;  %v1117_v10 = vld [vmem:[#allocation7 + $0xf4] sm:$0xf0]  ;;  %v952_v5 = vld [vmem:[#allocation7 + $0x30] sm:$0xf]  ;;  %s1297_s2 = smov [#allocation11]   ;;  %s786_s19 = sshll.u32 %s1412_s5, 4  ;;  %s787_s19 = int_to_ptr.hbm [resolvable:$true] %s786_s19 }
  0x31   :  { %297 = vmatpush.bf16.msra.mxu0 %v809_v16  ;;  %v1049_v13 = vor.u32 %v1117_v10, %v1048_v9  ;;  %v1050_v16 = vld [vmem:[#allocation7 + $0xf8] sm:$0xf0]  ;;  %v1093_v6 = vld [vmem:[#allocation7 + $0x34] sm:$0xf0]  ;;  %s784_s4 = sshll.u32 %s1297_s2, 4  ;;  %s785_s4 = int_to_ptr.vmem [resolvable:$true] %s784_s4 }
  0x32   :  { %310 = vmatpush.bf16.msra.mxu1 %v873_v17  ;;  %v1128_v37 = vpop.eup %1127  ;;  %v1053_v19 = vor.u32 %v1116_v15, %v1050_v16  ;;  %v954_v15 = vld [vmem:[#allocation7 + $0x38] sm:$0xf0]  ;;  %v1108_v16 = vld [vmem:[#allocation7 + $0xb4] sm:$0xf] }
  0x33   :  { %323 = vmatpush.bf16.msra.mxu2 %v813_v18  ;;  %v356_v38 = vmul.f32 8.0, %v1128_v37  ;;  %vm360_vm0 = vweird.f32 %v1128_v37  ;;  %v989_v18 = vor.u32 %v1100_v11, %v986_v14  ;;  %v1016_v11 = vld [vmem:[#allocation7 + $0xb0] sm:$0xf] }
  0x34   :  { %336 = vmatpush.bf16.msra.mxu3 %v877_v22  ;;  %v1040_v22 = vld [vmem:[#allocation7 + $0xe0] sm:$0xf] }
  0x35   :  { %298 = vmatpush.bf16.msra.mxu0 %v801_v28  ;;  %v357_v41 = vsub.f32 1.0, %v356_v38  ;;  %v1041_v28 = vor.u32 %v1115_v25, %v1040_v22  ;;  %v1097_v38 = vld [vmem:[#allocation7 + $0x54] sm:$0xf0]  ;;  %v1091_v22 = vld [vmem:[#allocation7 + $0x24] sm:$0xf0] }
  0x36   :  { %311 = vmatpush.bf16.msra.mxu1 %v865_v30  ;;  %v978_v30 = vld [vmem:[#allocation7 + $0x68] sm:$0xf0] }
  0x37   :  { %324 = vmatpush.bf16.msra.mxu2 %v805_v31  ;;  %v358_v44 = vmul.f32 %v1128_v37, %v357_v41  ;;  %v1114_v31 = vld [vmem:[#allocation7 + $0xe4] sm:$0xf] }
  0x38   :  { %337 = vmatpush.bf16.msra.mxu3 %v869_v33  ;;  %299 = vmatmul.bf16.vlgmr.msra.gmra.mxu0 %v97_v34  ;;  %v1042_v33 = vld [vmem:[#allocation7 + $0xe8] sm:$0xf0] }
  0x39   :  { %312 = vmatmul.bf16.vlgmr.msra.gmra.mxu1 %v98_v35  ;;  %v359_v50 = vadd.f32 %v1128_v37, %v358_v44  ;;  %634 = vmatpush.bf16.msrb.mxu0 %v985_v8  ;;  %v1045_v36 = vor.u32 %v1114_v31, %v1042_v33  ;;  %v1096_v44 = vld [vmem:[#allocation7 + $0x54] sm:$0xf]  ;;  %v1106_v31 = vld [vmem:[#allocation7 + $0xa4] sm:$0xf]  ;;  %v1010_v33 = vld [vmem:[#allocation7 + $0xa8] sm:$0xf0] }
  0x3a   :  { %325 = vmatmul.bf16.vlgmr.msra.gmra.mxu2 %v97_v34  ;;  %647 = vmatpush.bf16.msrb.mxu1 %v1049_v13  ;;  %v1092_v13 = vld [vmem:[#allocation7 + $0x34] sm:$0xf] }
  0x3b   :  { %338 = vmatmul.bf16.vlgmr.msra.gmra.mxu3 %v98_v35  ;;  %v1358_v56 = vsel %vm360_vm0, %v1128_v37, %v359_v50  ;;  %660 = vmatpush.bf16.msrb.mxu2 %v989_v18  ;;  %v981_v35 = vor.u32 %v1098_v26, %v978_v30  ;;  %v968_v37 = vld [vmem:[#allocation7 + $0x50] sm:$0xf]  ;;  %v953_v18 = vor.u32 %v1093_v6, %v952_v5  ;;  %v1008_v26 = vld [vmem:[#allocation7 + $0xa0] sm:$0xf]  ;;  %v946_v30 = vld [vmem:[#allocation7 + $0x28] sm:$0xf0] }
  0x3c   :  { %673 = vmatpush.bf16.msrb.mxu3 %v1053_v19  ;;  %v969_v41 = vor.u32 %v1097_v38, %v968_v37  ;;  %v1018_v19 = vld [vmem:[#allocation7 + $0xb8] sm:$0xf0]  ;;  %v936_v37 = vld [vmem:[#allocation7 + $0x10] sm:$0xf]  ;;  %v1089_v38 = vld [vmem:[#allocation7 + $0x14] sm:$0xf0] }
  0x3d   :  { %635 = vmatpush.bf16.msrb.mxu0 %v977_v24  ;;  %v957_v24 = vor.u32 %v1092_v13, %v954_v15  ;;  %v1021_v25 = vor.u32 %v1108_v16, %v1018_v19  ;;  %v95_v19 = vld [vmem:[#allocation8] sm:$0xf] }
  0x3e   :  { %648 = vmatpush.bf16.msrb.mxu1 %v1041_v28  ;;  %v1090_v28 = vld [vmem:[#allocation7 + $0x24] sm:$0xf] }
  0x3f   :  { %661 = vmatpush.bf16.msrb.mxu2 %v981_v35  ;;  %v945_v35 = vor.u32 %v1091_v22, %v944_v21 }
  0x40   :  { %674 = vmatpush.bf16.msrb.mxu3 %v1045_v36 }
  0x41   :  { %636 = vmatpush.bf16.msrb.mxu0 %v969_v41  ;;  %v949_v41 = vor.u32 %v1090_v28, %v946_v30 }
  0xb5   :  { %v300_v39 = vpop.f32.mrf.mxu0 }
  0xb6   :  { %v313_v40 = vpop.f32.mrf.mxu1 }
  0xb7   :  { %v1351_v42 = vadd.f32 %v313_v40, %v300_v39  ;;  %v1032_v39 = vld [vmem:[#allocation7 + $0xd0] sm:$0xf] }
  0xb9   :  { %v343_v43 = vrot.slane %v1351_v42, 4 }
  0xbb   :  { %v344_v45 = vadd.f32 %v343_v43, %v1351_v42  ;;  %v1113_v43 = vld [vmem:[#allocation7 + $0xd4] sm:$0xf0] }
  0xbd   :  { %v326_v46 = vpop.f32.mrf.mxu2  ;;  %v345_v47 = vrot.slane %v344_v45, 2  ;;  %v302_v49 = vpop.f32.mrf.mxu0 }
  0xbe   :  { %v339_v48 = vpop.f32.mrf.mxu3  ;;  %v315_v52 = vpop.f32.mrf.mxu1 }
  0xbf   :  { %v1355_v51 = vadd.f32 %v339_v48, %v326_v46  ;;  %v346_v53 = vadd.f32 %v345_v47, %v344_v45  ;;  %v1033_v46 = vor.u32 %v1113_v43, %v1032_v39  ;;  %v970_v47 = vld [vmem:[#allocation7 + $0x58] sm:$0xf0]  ;;  %v1112_v48 = vld [vmem:[#allocation7 + $0xd4] sm:$0xf]  ;;  %v1000_v39 = vld [vmem:[#allocation7 + $0x90] sm:$0xf]  ;;  %v1013_v43 = vor.u32 %v1106_v31, %v1010_v33 }
  0xc0   :  { %v973_v50 = vor.u32 %v1096_v44, %v970_v47  ;;  %v1034_v52 = vld [vmem:[#allocation7 + $0xd8] sm:$0xf0]  ;;  %v1105_v44 = vld [vmem:[#allocation7 + $0x94] sm:$0xf0] }
  0xc1   :  { %v349_v54 = vrot.slane %v1355_v51, 4  ;;  %v347_v55 = vrot.slane %v346_v53, 1  ;;  %649 = vmatpush.bf16.msrb.mxu1 %v1033_v46  ;;  %v938_v47 = vld [vmem:[#allocation7 + $0x18] sm:$0xf0] }
  0xc2   :  { %662 = vmatpush.bf16.msrb.mxu2 %v973_v50 }
  0xc3   :  { %v350_v57 = vadd.f32 %v349_v54, %v1355_v51  ;;  %v348_v58 = vadd.f32 %v347_v55, %v346_v53  ;;  %v960_v53 = vld [vmem:[#allocation7 + $0x40] sm:$0xf]  ;;  %v1095_v54 = vld [vmem:[#allocation7 + $0x44] sm:$0xf0] }
  0xc5   :  { %v351_v59 = vrot.slane %v350_v57, 2  ;;  %v328_v60 = vpop.f32.mrf.mxu2  ;;  %v1362_v61 = vmul.f32 %v1358_v56, %v348_v58  ;;  %v1024_v58 = vld [vmem:[#allocation7 + $0xc0] sm:$0xf] }
  0xc6   :  { %v341_v62 = vpop.f32.mrf.mxu3  ;;  %v1094_v60 = vld [vmem:[#allocation7 + $0x44] sm:$0xf] }
  0xc7   :  { %v352_v63 = vadd.f32 %v351_v59, %v350_v57  ;;  %v364_v0 = vsub.f32 %v1351_v42, %v1362_v61  ;;  %v1037_v57 = vor.u32 %v1112_v48, %v1034_v52  ;;  %v1111_v59 = vld [vmem:[#allocation7 + $0xc4] sm:$0xf0]  ;;  %v1104_v48 = vld [vmem:[#allocation7 + $0x94] sm:$0xf]  ;;  %v937_v52 = vor.u32 %v1089_v38, %v936_v37 }
  0xc9   :  { %v353_v1 = vrot.slane %v352_v63, 1  ;;  %v366_v2 = vmul.f32 %v364_v0, %v364_v0  ;;  %v962_v0 = vld [vmem:[#allocation7 + $0x48] sm:$0xf0]  ;;  %675 = vmatpush.bf16.msrb.mxu3 %v1037_v57 }
  0xca   :  { %v965_v9 = vor.u32 %v1094_v60, %v962_v0  ;;  %v1103_v60 = vld [vmem:[#allocation7 + $0x84] sm:$0xf0]  ;;  %v1102_v0 = vld [vmem:[#allocation7 + $0x84] sm:$0xf] }
  0xcb   :  { %v354_v3 = vadd.f32 %v353_v1, %v352_v63  ;;  %v368_v4 = vrot.slane %v366_v2, 4  ;;  %v961_v63 = vor.u32 %v1095_v54, %v960_v53  ;;  %v1110_v1 = vld [vmem:[#allocation7 + $0xc4] sm:$0xf]  ;;  %v1001_v53 = vor.u32 %v1105_v44, %v1000_v39  ;;  %v928_v54 = vld [vmem:[#allocation7] sm:$0xf] }
  0xcc   :  { %663 = vmatpush.bf16.msrb.mxu2 %v965_v9 }
  0xcd   :  { %v1367_v7 = vmul.f32 %v1358_v56, %v354_v3  ;;  %v369_v12 = vadd.f32 %v368_v4, %v366_v2  ;;  %v1025_v3 = vor.u32 %v1111_v59, %v1024_v58  ;;  %v1026_v4 = vld [vmem:[#allocation7 + $0xc8] sm:$0xf0]  ;;  %637 = vmatpush.bf16.msrb.mxu0 %v961_v63  ;;  %v992_v59 = vld [vmem:[#allocation7 + $0x80] sm:$0xf] }
  0xce   :  { %v1029_v10 = vor.u32 %v1110_v1, %v1026_v4  ;;  %v930_v63 = vld [vmem:[#allocation7 + $0x8] sm:$0xf0]  ;;  %v993_v4 = vor.u32 %v1103_v60, %v992_v59 }
  0xcf   :  { %v365_v17 = vsub.f32 %v1355_v51, %v1367_v7  ;;  %v370_v23 = vrot.slane %v369_v12, 2  ;;  %650 = vmatpush.bf16.msrb.mxu1 %v1025_v3  ;;  %v994_v1 = vld [vmem:[#allocation7 + $0x88] sm:$0xf0] }
  0xd0   :  { %676 = vmatpush.bf16.msrb.mxu3 %v1029_v10  ;;  %664 = vmatpush.bf16.msrb.mxu2 %v957_v24 }
  0xd1   :  { %v367_v27 = vmul.f32 %v365_v17, %v365_v17  ;;  %v371_v34 = vadd.f32 %v370_v23, %v369_v12  ;;  %v1109_v12 = vld [vmem:[#allocation7 + $0xb4] sm:$0xf0]  ;;  %638 = vmatpush.bf16.msrb.mxu0 %v953_v18 }
  0xd2   :  { %v1017_v20 = vor.u32 %v1109_v12, %v1016_v11 }
  0xd3   :  { %v374_v40 = vrot.slane %v367_v27, 4  ;;  %v372_v45 = vrot.slane %v371_v34, 1 }
  0xd4   :  { %651 = vmatpush.bf16.msrb.mxu1 %v1017_v20  ;;  %677 = vmatpush.bf16.msrb.mxu3 %v1021_v25 }
  0xd5   :  { %v375_v49 = vadd.f32 %v374_v40, %v367_v27  ;;  %v373_v55 = vadd.f32 %v372_v45, %v371_v34  ;;  %v1107_v27 = vld [vmem:[#allocation7 + $0xa4] sm:$0xf0]  ;;  %v1088_v45 = vld [vmem:[#allocation7 + $0x14] sm:$0xf]  ;;  %639 = vmatpush.bf16.msrb.mxu0 %v945_v35  ;;  %665 = vmatpush.bf16.msrb.mxu2 %v949_v41 }
  0xd6   :  { %v1009_v36 = vor.u32 %v1107_v27, %v1008_v26  ;;  %v941_v57 = vor.u32 %v1088_v45, %v938_v47 }
  0xd7   :  { %v376_v62 = vrot.slane %v375_v49, 2  ;;  %v380_v2 = vmul.f32 %v373_v55, %v1358_v56  ;;  %v1087_v55 = vld [vmem:[#allocation7 + $0x4] sm:$0xf0] }
  0xd8   :  { %652 = vmatpush.bf16.msrb.mxu1 %v1009_v36  ;;  %678 = vmatpush.bf16.msrb.mxu3 %v1013_v43  ;;  %v929_v3 = vor.u32 %v1087_v55, %v928_v54 }
  0xd9   :  { %v377_v8 = vadd.f32 %v376_v62, %v375_v49  ;;  %v1372_v14 = vadd.f32 1e-05, %v380_v2  ;;  %v1002_v49 = vld [vmem:[#allocation7 + $0x98] sm:$0xf0]  ;;  %v1086_v62 = vld [vmem:[#allocation7 + $0x4] sm:$0xf]  ;;  %640 = vmatpush.bf16.msrb.mxu0 %v937_v52  ;;  %666 = vmatpush.bf16.msrb.mxu2 %v941_v57 }
  0xda   :  { %v1005_v58 = vor.u32 %v1104_v48, %v1002_v49  ;;  %v933_v6 = vor.u32 %v1086_v62, %v930_v63 }
  0xdb   :  { %v378_v17 = vrot.slane %v377_v8, 1  ;;  %1129 = vrsqrt.f32 %v1372_v14  ;;  %vm390_vm5 = vweird.f32 %v1372_v14 }
  0xdc   :  { %653 = vmatpush.bf16.msrb.mxu1 %v1001_v53  ;;  %679 = vmatpush.bf16.msrb.mxu3 %v1005_v58 }
  0xdd   :  { %v379_v23 = vadd.f32 %v378_v17, %v377_v8  ;;  %v997_v8 = vor.u32 %v1102_v0, %v994_v1  ;;  %641 = vmatpush.bf16.msrb.mxu0 %v929_v3  ;;  %667 = vmatpush.bf16.msrb.mxu2 %v933_v6 }
  0xdf   :  { %v381_v34 = vmul.f32 %v379_v23, %v1358_v56 }
  0xe0   :  { %654 = vmatpush.bf16.msrb.mxu1 %v993_v4  ;;  %680 = vmatpush.bf16.msrb.mxu3 %v997_v8 }
  0xe1   :  { %v383_v40 = vadd.f32 1e-05, %v381_v34  ;;  %v1130_v46 = vpop.eup %1129 }
  0xe2   :  { %v385_v50 = vmul.f32 %v1130_v46, %v1372_v14  ;;  %vm391_vm2 = vweird.f32 %v1130_v46 }
  0xe3   :  { %1131 = vrsqrt.f32 %v383_v40  ;;  %vm400_vm3 = vweird.f32 %v383_v40  ;;  %vm392_vm7 = vmor %vm390_vm5, %vm391_vm2 }
  0xe4   :  { %v386_v2 = vmul.f32 %v1130_v46, %v385_v50 }
  0xe6   :  { %v387_v10 = vmul.f32 0.5, %v386_v2 }
  0xe8   :  { %v388_v12 = vsub.f32 1.5, %v387_v10 }
  0xe9   :  { %v1132_v5 = vpop.eup %1131 }
  0xea   :  { %v395_v9 = vmul.f32 %v1132_v5, %v383_v40  ;;  %vm401_vm1 = vweird.f32 %v1132_v5  ;;  %v389_v16 = vmul.f32 %v1130_v46, %v388_v12 }
  0xeb   :  { %vm402_vm4 = vmor %vm400_vm3, %vm401_vm1 }
  0xec   :  { %v396_v11 = vmul.f32 %v1132_v5, %v395_v9  ;;  %v393_v21 = vsel %vm392_vm7, %v1130_v46, %v389_v16 }
  0xee   :  { %v397_v13 = vmul.f32 0.5, %v396_v11 }
  0xf0   :  { %v398_v15 = vsub.f32 1.5, %v397_v13 }
  0xf2   :  { %v399_v17 = vmul.f32 %v1132_v5, %v398_v15 }
  0xf4   :  { %v403_v18 = vsel %vm402_vm4, %v1132_v5, %v399_v17 }
  0xf5   :  { %v406_v20 = vrot.slane %v403_v18, 6 }
  0xf7   :  { %v408_v22 = vsel %vm407_vm6, %v393_v21, %v406_v20 }
  0xf8   :  { %v410_v23 = vmul.f32 %v408_v22, %v95_v19 }
  0xfa   :  { %v412_v24 = vperm.slane %v410_v23, 0  ;;  %v413_v25 = vperm.slane %v410_v23, 2 }
  0xfc   :  { %v417_v26 = vmul.f32 %v413_v25, %v1367_v7  ;;  %v416_v27 = vmul.f32 %v412_v24, %v1362_v61  ;;  %v425_v33 = vperm.slane %v412_v24, 0  ;;  %v426_v34 = vperm.slane %v413_v25, 0 }
  0xfe   :  { %v420_v28 = vrot.slane %v417_v26, 6  ;;  %v427_v37 = vmul.f32 %v425_v33, %v1351_v42  ;;  %v428_v39 = vmul.f32 %v426_v34, %v1355_v51 }
 0x100   :  { %v421_v30 = vsel %vm407_vm6, %v416_v27, %v420_v28 }
 0x101   :  { %v422_v31 = vrot.slane %v421_v30, 7 }
 0x103   :  { %v424_v14 = vsub.f32 %v95_v19, %v422_v31 }
 0x105   :  { %v430_v35 = vperm.slane %v424_v14, 1  ;;  %v431_v36 = vperm.slane %v424_v14, 3 }
 0x107   :  { %v434_v38 = vperm.slane %v430_v35, 1  ;;  %v435_v40 = vperm.slane %v431_v36, 1 }
 0x109   :  { %v436_v41 = vadd.f32 %v434_v38, %v427_v37  ;;  %v437_v43 = vadd.f32 %v435_v40, %v428_v39 }
 0x10b   :  { %v438_v7 = vmax.f32 %v436_v41, 0.0  ;;  %v439_v44 = vmax.f32 %v437_v43, 0.0  ;;  %v96_v43 = vld [vmem:[#allocation10] sm:$0xf] }
 0x10d   :  { %v440_v61 = vpack.c.bf16 %v438_v7, %v438_v7  ;;  %v441_v45 = vpack.c.bf16 %v439_v44, %v439_v44 }
 0x10f   :  { %642 = vmatmul.bf16.vlgmr.msrb.gmra.mxu0 %v440_v61  ;;  %655 = vmatmul.bf16.vlgmr.msrb.gmra.mxu1 %v441_v45 }
 0x110   :  { %668 = vmatmul.bf16.vlgmr.msrb.gmra.mxu2 %v440_v61  ;;  %681 = vmatmul.bf16.vlgmr.msrb.gmra.mxu3 %v441_v45 }
 0x18c   :  { %v643_v46 = vpop.f32.mrf.mxu0  ;;  %v656_v47 = vpop.f32.mrf.mxu1 }
 0x18d   :  { %v1384_v48 = vadd.f32 %v656_v47, %v643_v46 }
 0x18f   :  { %v686_v42 = vrot.slane %v1384_v48, 4 }
 0x191   :  { %v687_v49 = vadd.f32 %v686_v42, %v1384_v48 }
 0x193   :  { %v688_v51 = vrot.slane %v687_v49, 2  ;;  %v669_v50 = vpop.f32.mrf.mxu2  ;;  %v682_v52 = vpop.f32.mrf.mxu3 }
 0x194   :  { %v1388_v53 = vadd.f32 %v682_v52, %v669_v50  ;;  %v645_v54 = vpop.f32.mrf.mxu0  ;;  %v658_v55 = vpop.f32.mrf.mxu1 }
 0x195   :  { %v689_v57 = vadd.f32 %v688_v51, %v687_v49 }
 0x196   :  { %v692_v58 = vrot.slane %v1388_v53, 4 }
 0x197   :  { %v690_v59 = vrot.slane %v689_v57, 1 }
 0x198   :  { %v693_v60 = vadd.f32 %v692_v58, %v1388_v53 }
 0x199   :  { %v691_v62 = vadd.f32 %v690_v59, %v689_v57 }
 0x19a   :  { %v694_v63 = vrot.slane %v693_v60, 2 }
 0x19b   :  { %v698_v0 = vmul.f32 %v691_v62, %v1358_v56  ;;  %v671_v1 = vpop.f32.mrf.mxu2  ;;  %v684_v2 = vpop.f32.mrf.mxu3 }
 0x19c   :  { %v695_v3 = vadd.f32 %v694_v63, %v693_v60 }
 0x19d   :  { %v700_v4 = vsub.f32 %v1384_v48, %v698_v0 }
 0x19e   :  { %v696_v5 = vrot.slane %v695_v3, 1 }
 0x19f   :  { %v702_v6 = vmul.f32 %v700_v4, %v700_v4 }
 0x1a0   :  { %v697_v8 = vadd.f32 %v696_v5, %v695_v3 }
 0x1a1   :  { %v704_v9 = vrot.slane %v702_v6, 4 }
 0x1a2   :  { %v699_v10 = vmul.f32 %v697_v8, %v1358_v56 }
 0x1a3   :  { %v705_v11 = vadd.f32 %v704_v9, %v702_v6 }
 0x1a4   :  { %v701_v12 = vsub.f32 %v1388_v53, %v699_v10 }
 0x1a5   :  { %v706_v13 = vrot.slane %v705_v11, 2 }
 0x1a6   :  { %v703_v15 = vmul.f32 %v701_v12, %v701_v12 }
 0x1a7   :  { %v707_v16 = vadd.f32 %v706_v13, %v705_v11 }
 0x1a8   :  { %v710_v17 = vrot.slane %v703_v15, 4 }
 0x1a9   :  { %v708_v18 = vrot.slane %v707_v16, 1 }
 0x1aa   :  { %v711_v19 = vadd.f32 %v710_v17, %v703_v15 }
 0x1ab   :  { %v709_v20 = vadd.f32 %v708_v18, %v707_v16 }
 0x1ac   :  { %v712_v21 = vrot.slane %v711_v19, 2 }
 0x1ad   :  { %v716_v22 = vmul.f32 %v709_v20, %v1358_v56 }
 0x1ae   :  { %v713_v23 = vadd.f32 %v712_v21, %v711_v19 }
 0x1af   :  { %v718_v24 = vadd.f32 1e-05, %v716_v22 }
 0x1b0   :  { %v714_v25 = vrot.slane %v713_v23, 1 }
 0x1b1   :  { %1133 = vrsqrt.f32 %v718_v24  ;;  %vm726_vm12 = vweird.f32 %v718_v24 }
 0x1b2   :  { %v715_v26 = vadd.f32 %v714_v25, %v713_v23 }
 0x1b4   :  { %v717_v27 = vmul.f32 %v715_v26, %v1358_v56 }
 0x1b6   :  { %v719_v28 = vadd.f32 1e-05, %v717_v27 }
 0x1b7   :  { %v1134_v30 = vpop.eup %1133 }
 0x1b8   :  { %v721_v31 = vmul.f32 %v1134_v30, %v718_v24  ;;  %1135 = vrsqrt.f32 %v719_v28  ;;  %vm727_vm9 = vweird.f32 %v1134_v30  ;;  %vm736_vm10 = vweird.f32 %v719_v28 }
 0x1b9   :  { %vm728_vm13 = vmor %vm726_vm12, %vm727_vm9 }
 0x1ba   :  { %v722_v14 = vmul.f32 %v1134_v30, %v721_v31 }
 0x1bc   :  { %v723_v34 = vmul.f32 0.5, %v722_v14 }
 0x1be   :  { %v1136_v33 = vpop.eup %1135  ;;  %v724_v37 = vsub.f32 1.5, %v723_v34 }
 0x1bf   :  { %v731_v35 = vmul.f32 %v1136_v33, %v719_v28  ;;  %vm737_vm8 = vweird.f32 %v1136_v33 }
 0x1c0   :  { %v725_v40 = vmul.f32 %v1134_v30, %v724_v37  ;;  %vm738_vm11 = vmor %vm736_vm10, %vm737_vm8 }
 0x1c1   :  { %v732_v36 = vmul.f32 %v1136_v33, %v731_v35 }
 0x1c2   :  { %v729_v44 = vsel %vm728_vm13, %v1134_v30, %v725_v40 }
 0x1c3   :  { %v733_v38 = vmul.f32 0.5, %v732_v36 }
 0x1c5   :  { %v734_v39 = vsub.f32 1.5, %v733_v38 }
 0x1c7   :  { %v735_v41 = vmul.f32 %v1136_v33, %v734_v39 }
 0x1c9   :  { %v739_v56 = vsel %vm738_vm11, %v1136_v33, %v735_v41 }
 0x1ca   :  { %v742_v7 = vrot.slane %v739_v56, 6 }
 0x1cc   :  { %v743_v61 = vsel %vm407_vm6, %v729_v44, %v742_v7 }
 0x1cd   :  { %v745_v45 = vmul.f32 %v743_v61, %v96_v43 }
 0x1cf   :  { %v748_v46 = vperm.slane %v745_v45, 2  ;;  %v747_v47 = vperm.slane %v745_v45, 0 }
 0x1d1   :  { %v752_v42 = vmul.f32 %v748_v46, %v699_v10  ;;  %v751_v51 = vmul.f32 %v747_v47, %v698_v0  ;;  %v761_v54 = vperm.slane %v748_v46, 0  ;;  %v760_v57 = vperm.slane %v747_v47, 0 }
 0x1d3   :  { %v755_v49 = vrot.slane %v752_v42, 6  ;;  %v763_v60 = vmul.f32 %v761_v54, %v1388_v53  ;;  %v762_v62 = vmul.f32 %v760_v57, %v1384_v48 }
 0x1d5   :  { %v756_v50 = vsel %vm407_vm6, %v751_v51, %v755_v49 }
 0x1d6   :  { %v757_v52 = vrot.slane %v756_v50, 7 }
 0x1d8   :  { %v759_v55 = vsub.f32 %v96_v43, %v757_v52 }
 0x1da   :  { %v765_v58 = vperm.slane %v759_v55, 1  ;;  %v766_v59 = vperm.slane %v759_v55, 3 }
 0x1dc   :  { %v769_v63 = vperm.slane %v765_v58, 1  ;;  %v770_v1 = vperm.slane %v766_v59, 1 }
 0x1de   :  { %v771_v2 = vadd.f32 %v769_v63, %v762_v62  ;;  %v772_v3 = vadd.f32 %v770_v1, %v763_v60 }
 0x1e0   :  { %v773_v4 = vadd.f32 %v771_v2, %v1343_v29  ;;  %v774_v0 = vadd.f32 %v772_v3, %v1345_v32 }
 0x1e2   :  { %v775_v5 = vmax.f32 %v773_v4, 0.0  ;;  %v776_v6 = vmax.f32 %v774_v0, 0.0 }
 0x1e4   :  { %777 = vst [vmem:[#allocation11] sm:$0xff] %v775_v5 }
 0x1e5   :  { %778 = vst [vmem:[#allocation11 + $0x8] sm:$0xff] %v776_v6 }
 0x1e6   :  { %789 = dma.vmem_to_hbm [thread:$0]  %s785_s4, 256, %s787_s19, [#allocation4]  }
 0x1e7   :  { %1287 = dma.done.wait [#allocation4], 256  }
 0x1e8   :  { %1288 = vsyncadd [#allocation4], 4294967040 }
 0x1e9   :  { %794 = vsyncpa [#allocation3], 1 }
 0x1ea   :  { %795 = vsyncpa [#allocation6], 1 }
 0x1eb   :  { %796 = vsyncpa [#allocation9], 1 }
 0x1ec   :  { %797 = vsyncpa [#allocation4], 1 }

</bundles_post_ra>
